<compile_context>
chip_gen: v7x
topology: tpu7x:2x2x1
jax: 0.10.0
libtpu: 0.0.40
codegen_flags: <defaults>
</compile_context>

<pallas_src>
import functools

import jax
import jax.numpy as jnp
from jax.experimental import pallas as pl
from jax.experimental.pallas import tpu as pltpu


def _mvnn_kernel(x_ref, w1_ref, b1_ref, t1_ref,
                 w2_ref, b2_ref, t2_ref,
                 wout_ref, wskip_ref,
                 out_ref):
    x_in = x_ref[...]                                                  # [bm, D] raw input

    # Hidden layer 1: diag(1/capacity) is pre-folded into w1 -> single MXU matmul.
    z1 = jnp.dot(x_in, w1_ref[...], preferred_element_type=jnp.float32) + b1_ref[...]
    h1 = jnp.clip(z1, 0.0, t1_ref[...])                                # [bm, H] bounded ReLU

    # Hidden layer 2: linear + bounded ReLU.
    z2 = jnp.dot(h1, w2_ref[...], preferred_element_type=jnp.float32) + b2_ref[...]
    h2 = jnp.clip(z2, 0.0, t2_ref[...])                                # [bm, H]

    # Epilogue: output width is 1, so skip the MXU entirely.
    # y[b] = sum_h h2[b,h]*wout[h] + sum_d x[b,d]*wskip[d]   (VPU mul + XLU lane reduce)
    y = (jnp.sum(h2 * wout_ref[...], axis=-1)
         + jnp.sum(x_in * wskip_ref[...], axis=-1))                    # [bm]

    # Lane-dense store: batch sits on the lane axis.
    out_ref[...] = y[None, :].astype(out_ref.dtype)                    # [1, bm]


@functools.partial(jax.jit, static_argnames=("block_b",))
def mvnn_generic_forward(x, w1, b1, t1, w2, b2, t2, wout_row, wskip_row, *, block_b=128):
    """x: [B, D]; w1: [D, H] (capacity already folded in); b/t: [1, H];
    wout_row: [1, H]; wskip_row: [1, D]. Returns [B, 1]."""
    B, D = x.shape
    H = w1.shape[1]

    if B <= block_b:
        bm, Bp = B, B                       # single full-array block
    else:
        bm = block_b
        Bp = ((B + bm - 1) // bm) * bm
        if Bp != B:
            x = jnp.pad(x, ((0, Bp - B), (0, 0)))

    weight_spec = lambda shp: pl.BlockSpec(shp, lambda i: (0, 0))

    out = pl.pallas_call(
        _mvnn_kernel,
        out_shape=jax.ShapeDtypeStruct((1, Bp), jnp.float32),
        grid=(Bp // bm,),
        in_specs=[
            pl.BlockSpec((bm, D), lambda i: (i, 0)),   # x (batch-tiled)
            weight_spec((D, H)),                       # w1 (capacity folded in)
            weight_spec((1, H)),                       # b1
            weight_spec((1, H)),                       # t1
            weight_spec((H, H)),                       # w2
            weight_spec((1, H)),                       # b2
            weight_spec((1, H)),                       # t2
            weight_spec((1, H)),                       # wout row
            weight_spec((1, D)),                       # wskip row
        ],
        out_specs=pl.BlockSpec((1, bm), lambda i: (0, i)),
        compiler_params=pltpu.CompilerParams(
            dimension_semantics=("parallel",)),        # shards batch across 2 TCs on v7x
    )(x, w1, b1, t1, w2, b2, t2, wout_row, wskip_row)

    return out[0, :B][:, None]                         # back to module's (B, 1) layout


def prepare_params(capacity, w1, b1, t1, w2, b2, t2, wout, wskip):
    """One-time parameter prep (NOT in the per-call hot path):
    folds diag(1/capacity) into W1 and lays out the N=1 epilogue weights as rows."""
    inv_cap = (1.0 / capacity).astype(jnp.float32)                     # [D]
    w1_eff = inv_cap[:, None] * w1                                     # [D, H]
    return (w1_eff,
            b1.reshape(1, -1), t1.reshape(1, -1),
            w2,
            b2.reshape(1, -1), t2.reshape(1, -1),
            wout.reshape(1, -1),                                       # [1, H]
            wskip.reshape(1, -1))                                      # [1, D]


def _reference(x, capacity, w1, b1, t1, w2, b2, t2, wout, wskip):
    h = x / capacity
    h1 = jnp.clip(h @ w1 + b1, 0.0, t1)
    h2 = jnp.clip(h1 @ w2 + b2, 0.0, t2)
    return h2 @ wout + x @ wskip


if __name__ == "__main__":
    # Module hyperparameters (consistent with the PyTorch __init__); batch raised to >=128
    # so the kernel fills (8,128) tiles and the lane-dense output is a full lane width.
    batch = 256
    input_dim = 16          # number of generic goods
    num_hidden_units = 64
    # num_hidden_layers = 2  (fc1 + one extra hidden layer)

    key = jax.random.PRNGKey(0)
    k_x, k_cap, k_w1, k_b1, k_t1, k_w2, k_b2, k_t2, k_wo = jax.random.split(key, 9)

    # Input bundle (non-negative quantities of generic goods).
    x = jax.random.uniform(k_x, (batch, input_dim), jnp.float32, 0.0, 5.0)

    # capacity_generic_goods > 0 ; generic_trafo weight = diag(1/capacity).
    capacity = jax.random.uniform(k_cap, (input_dim,), jnp.float32, 1.0, 10.0)

    # MVNN layers: non-negative weights, biases, bReLU cutoffs t > 0.
    # Stored as [in, out] so the kernel computes x @ W.
    w1 = jax.random.uniform(k_w1, (input_dim, num_hidden_units), jnp.float32, 0.0, 0.5)
    b1 = jax.random.uniform(k_b1, (num_hidden_units,), jnp.float32, -0.1, 0.1)
    t1 = jax.random.uniform(k_t1, (num_hidden_units,), jnp.float32, 0.5, 1.0)

    w2 = jax.random.uniform(k_w2, (num_hidden_units, num_hidden_units), jnp.float32, 0.0, 0.5)
    b2 = jax.random.uniform(k_b2, (num_hidden_units,), jnp.float32, -0.1, 0.1)
    t2 = jax.random.uniform(k_t2, (num_hidden_units,), jnp.float32, 0.5, 1.0)

    # Output layer: linear, no bias, no bReLU.
    wout = jax.random.uniform(k_wo, (num_hidden_units, 1), jnp.float32, 0.0, 0.5)

    # lin_skip_connection=True with init_method='zero' -> zero (but present) weight matrix.
    wskip = jnp.zeros((input_dim, 1), jnp.float32)

    params = prepare_params(capacity, w1, b1, t1, w2, b2, t2, wout, wskip)
    out = mvnn_generic_forward(x, *params)
    out = jax.block_until_ready(out)

    ref = _reference(x, capacity,
                     w1, b1.reshape(1, -1), t1.reshape(1, -1),
                     w2, b2.reshape(1, -1), t2.reshape(1, -1),
                     wout, wskip)

    assert out.shape == (batch, 1)
    assert jnp.allclose(out, ref, atol=1e-4, rtol=1e-4)

    print("KERNEL_OK")
</pallas_src>

<mosaic_0001>
module attributes {stable_mosaic.version = 11 : i64} {
  func.func @_mvnn_kernel(%arg0: i32, %arg1: memref<128x16xf32, #tpu.memory_space<vmem>>, %arg2: memref<16x64xf32, #tpu.memory_space<vmem>>, %arg3: memref<1x64xf32, #tpu.memory_space<vmem>>, %arg4: memref<1x64xf32, #tpu.memory_space<vmem>>, %arg5: memref<64x64xf32, #tpu.memory_space<vmem>>, %arg6: memref<1x64xf32, #tpu.memory_space<vmem>>, %arg7: memref<1x64xf32, #tpu.memory_space<vmem>>, %arg8: memref<1x64xf32, #tpu.memory_space<vmem>>, %arg9: memref<1x16xf32, #tpu.memory_space<vmem>>, %arg10: memref<1x128xf32, #tpu.memory_space<vmem>>) attributes {dimension_semantics = [#tpu.dimension_semantics<parallel>], iteration_bounds = array<i64: 2>, scalar_prefetch = 0 : i64, scratch_operands = 0 : i64, tpu.core_type = #tpu.core_type<tc>, window_params = [{transform_indices = @transform_0, window_bounds = array<i64: 128, 16>}, {pipeline_mode = #tpu.pipeline_mode<synchronous>, transform_indices = @transform_1, window_bounds = array<i64: 16, 64>}, {pipeline_mode = #tpu.pipeline_mode<synchronous>, transform_indices = @transform_2, window_bounds = array<i64: 1, 64>}, {pipeline_mode = #tpu.pipeline_mode<synchronous>, transform_indices = @transform_3, window_bounds = array<i64: 1, 64>}, {pipeline_mode = #tpu.pipeline_mode<synchronous>, transform_indices = @transform_4, window_bounds = array<i64: 64, 64>}, {pipeline_mode = #tpu.pipeline_mode<synchronous>, transform_indices = @transform_5, window_bounds = array<i64: 1, 64>}, {pipeline_mode = #tpu.pipeline_mode<synchronous>, transform_indices = @transform_6, window_bounds = array<i64: 1, 64>}, {pipeline_mode = #tpu.pipeline_mode<synchronous>, transform_indices = @transform_7, window_bounds = array<i64: 1, 64>}, {pipeline_mode = #tpu.pipeline_mode<synchronous>, transform_indices = @transform_8, window_bounds = array<i64: 1, 16>}, {transform_indices = @transform_9, window_bounds = array<i64: 1, 128>}]} {
    %c0 = arith.constant 0 : index
    %c0_0 = arith.constant 0 : index
    %0 = vector.load %arg1[%c0, %c0_0] : memref<128x16xf32, #tpu.memory_space<vmem>>, vector<128x16xf32>
    %c0_1 = arith.constant 0 : index
    %c0_2 = arith.constant 0 : index
    %1 = vector.load %arg2[%c0_1, %c0_2] : memref<16x64xf32, #tpu.memory_space<vmem>>, vector<16x64xf32>
    %cst = arith.constant dense<0.000000e+00> : vector<128x64xf32>
    %2 = tpu.matmul %0, %1, %cst {dimension_numbers = #tpu.dot_dimension_numbers<[1], [0], [0], [1], [0, 0, 1, 1], [], []>} : vector<128x16xf32>, vector<16x64xf32>, vector<128x64xf32> -> vector<128x64xf32>
    %c0_3 = arith.constant 0 : index
    %c0_4 = arith.constant 0 : index
    %3 = vector.load %arg3[%c0_3, %c0_4] : memref<1x64xf32, #tpu.memory_space<vmem>>, vector<1x64xf32>
    %4 = vector.broadcast %3 : vector<1x64xf32> to vector<128x64xf32>
    %5 = arith.addf %2, %4 : vector<128x64xf32>
    %c0_5 = arith.constant 0 : index
    %c0_6 = arith.constant 0 : index
    %6 = vector.load %arg4[%c0_5, %c0_6] : memref<1x64xf32, #tpu.memory_space<vmem>>, vector<1x64xf32>
    %cst_7 = arith.constant 0.000000e+00 : f32
    %7 = vector.broadcast %cst_7 : f32 to vector<128x64xf32>
    %8 = arith.maximumf %7, %5 : vector<128x64xf32>
    %9 = vector.broadcast %6 : vector<1x64xf32> to vector<128x64xf32>
    %10 = arith.minimumf %9, %8 : vector<128x64xf32>
    %c0_8 = arith.constant 0 : index
    %c0_9 = arith.constant 0 : index
    %11 = vector.load %arg5[%c0_8, %c0_9] : memref<64x64xf32, #tpu.memory_space<vmem>>, vector<64x64xf32>
    %cst_10 = arith.constant dense<0.000000e+00> : vector<128x64xf32>
    %12 = tpu.matmul %10, %11, %cst_10 {dimension_numbers = #tpu.dot_dimension_numbers<[1], [0], [0], [1], [0, 0, 1, 1], [], []>} : vector<128x64xf32>, vector<64x64xf32>, vector<128x64xf32> -> vector<128x64xf32>
    %c0_11 = arith.constant 0 : index
    %c0_12 = arith.constant 0 : index
    %13 = vector.load %arg6[%c0_11, %c0_12] : memref<1x64xf32, #tpu.memory_space<vmem>>, vector<1x64xf32>
    %14 = vector.broadcast %13 : vector<1x64xf32> to vector<128x64xf32>
    %15 = arith.addf %12, %14 : vector<128x64xf32>
    %c0_13 = arith.constant 0 : index
    %c0_14 = arith.constant 0 : index
    %16 = vector.load %arg7[%c0_13, %c0_14] : memref<1x64xf32, #tpu.memory_space<vmem>>, vector<1x64xf32>
    %cst_15 = arith.constant 0.000000e+00 : f32
    %17 = vector.broadcast %cst_15 : f32 to vector<128x64xf32>
    %18 = arith.maximumf %17, %15 : vector<128x64xf32>
    %19 = vector.broadcast %16 : vector<1x64xf32> to vector<128x64xf32>
    %20 = arith.minimumf %19, %18 : vector<128x64xf32>
    %c0_16 = arith.constant 0 : index
    %c0_17 = arith.constant 0 : index
    %21 = vector.load %arg8[%c0_16, %c0_17] : memref<1x64xf32, #tpu.memory_space<vmem>>, vector<1x64xf32>
    %22 = vector.broadcast %21 : vector<1x64xf32> to vector<128x64xf32>
    %23 = arith.mulf %20, %22 : vector<128x64xf32>
    %cst_18 = arith.constant dense<0.000000e+00> : vector<128xf32>
    %24 = vector.multi_reduction <add>, %23, %cst_18 [1] : vector<128x64xf32> to vector<128xf32>
    %c0_19 = arith.constant 0 : index
    %c0_20 = arith.constant 0 : index
    %25 = vector.load %arg9[%c0_19, %c0_20] : memref<1x16xf32, #tpu.memory_space<vmem>>, vector<1x16xf32>
    %26 = vector.broadcast %25 : vector<1x16xf32> to vector<128x16xf32>
    %27 = arith.mulf %0, %26 : vector<128x16xf32>
    %cst_21 = arith.constant dense<0.000000e+00> : vector<128xf32>
    %28 = vector.multi_reduction <add>, %27, %cst_21 [1] : vector<128x16xf32> to vector<128xf32>
    %29 = arith.addf %24, %28 : vector<128xf32>
    %30 = vector.shape_cast %29 : vector<128xf32> to vector<1x128xf32>
    %c0_22 = arith.constant 0 : index
    %c0_23 = arith.constant 0 : index
    %31 = vector.load %arg10[%c0_22, %c0_23] : memref<1x128xf32, #tpu.memory_space<vmem>>, vector<1x128xf32>
    tpu.vector_store %arg10[%c0_22, %c0_23], %30 {strides = array<i32>} : memref<1x128xf32, #tpu.memory_space<vmem>>, vector<1x128xf32>,
    return
  }
  func.func @transform_0(%arg0: i32) -> (i32, i32) {
    %c0_i32 = arith.constant 0 : i32
    %c0_i32_0 = arith.constant 0 : i32
    return %arg0, %c0_i32 : i32, i32
  }
  func.func @transform_1(%arg0: i32) -> (i32, i32) {
    %c0_i32 = arith.constant 0 : i32
    %c0_i32_0 = arith.constant 0 : i32
    %c0_i32_1 = arith.constant 0 : i32
    return %c0_i32, %c0_i32_0 : i32, i32
  }
  func.func @transform_2(%arg0: i32) -> (i32, i32) {
    %c0_i32 = arith.constant 0 : i32
    %c0_i32_0 = arith.constant 0 : i32
    %c0_i32_1 = arith.constant 0 : i32
    return %c0_i32, %c0_i32_0 : i32, i32
  }
  func.func @transform_3(%arg0: i32) -> (i32, i32) {
    %c0_i32 = arith.constant 0 : i32
    %c0_i32_0 = arith.constant 0 : i32
    %c0_i32_1 = arith.constant 0 : i32
    return %c0_i32, %c0_i32_0 : i32, i32
  }
  func.func @transform_4(%arg0: i32) -> (i32, i32) {
    %c0_i32 = arith.constant 0 : i32
    %c0_i32_0 = arith.constant 0 : i32
    %c0_i32_1 = arith.constant 0 : i32
    return %c0_i32, %c0_i32_0 : i32, i32
  }
  func.func @transform_5(%arg0: i32) -> (i32, i32) {
    %c0_i32 = arith.constant 0 : i32
    %c0_i32_0 = arith.constant 0 : i32
    %c0_i32_1 = arith.constant 0 : i32
    return %c0_i32, %c0_i32_0 : i32, i32
  }
  func.func @transform_6(%arg0: i32) -> (i32, i32) {
    %c0_i32 = arith.constant 0 : i32
    %c0_i32_0 = arith.constant 0 : i32
    %c0_i32_1 = arith.constant 0 : i32
    return %c0_i32, %c0_i32_0 : i32, i32
  }
  func.func @transform_7(%arg0: i32) -> (i32, i32) {
    %c0_i32 = arith.constant 0 : i32
    %c0_i32_0 = arith.constant 0 : i32
    %c0_i32_1 = arith.constant 0 : i32
    return %c0_i32, %c0_i32_0 : i32, i32
  }
  func.func @transform_8(%arg0: i32) -> (i32, i32) {
    %c0_i32 = arith.constant 0 : i32
    %c0_i32_0 = arith.constant 0 : i32
    %c0_i32_1 = arith.constant 0 : i32
    return %c0_i32, %c0_i32_0 : i32, i32
  }
  func.func @transform_9(%arg0: i32) -> (i32, i32) {
    %c0_i32 = arith.constant 0 : i32
    %c0_i32_0 = arith.constant 0 : i32
    return %c0_i32, %arg0 : i32, i32
  }
}

</mosaic_0001>

<bundles_post_ra>
// kernel: mvnn_generic_forward.1
= control target key start
LH: loop header
LB: loop body
LE: loop exit
PB: predicated region body
PF: predicated region fallthrough
CT: control target
= control target key end

     0   :  { %14 = vsyncpa [#allocation3], 0  ;;  %s1958_s0 = inlined_call_operand.vmem [shape: f32[256,16], index: 0, kind: input, shape index: {}]   ;;  %s1959_s1 = inlined_call_operand.vmem [shape: f32[16,64], index: 1, kind: input, shape index: {}]   ;;  %s1960_s2 = inlined_call_operand.vmem [shape: f32[1,64], index: 2, kind: input, shape index: {}]   ;;  %s1961_s3 = inlined_call_operand.vmem [shape: f32[1,64], index: 3, kind: input, shape index: {}]   ;;  %s1962_s4 = inlined_call_operand.vmem [shape: f32[64,64], index: 4, kind: input, shape index: {}]   ;;  %s1963_s5 = inlined_call_operand.vmem [shape: f32[1,64], index: 5, kind: input, shape index: {}]   ;;  %s1964_s6 = inlined_call_operand.vmem [shape: f32[1,64], index: 6, kind: input, shape index: {}]   ;;  %s1965_s7 = inlined_call_operand.vmem [shape: f32[1,64], index: 7, kind: input, shape index: {}]   ;;  %s1966_s8 = inlined_call_operand.vmem [shape: f32[1,16], index: 8, kind: input, shape index: {}]   ;;  %s1967_s9 = inlined_call_operand.hbm [shape: f32[1,256], index: 9, kind: output, shape index: {}]  }
   0x1   :  { %16 = vsyncpa [#allocation3 + $0x1], 0  ;;  %s1532_s30 = smov 0   ;;  %s1534_s10 = smov 0  }
   0x2   :  { %s1536_s11 = smov 0   ;;  %s1538_s12 = smov 0  }
   0x3 LB: > { %s1192_s13 = sadd.s32 4294967295, %s1479_s12   ;;  %s1193_s14 = sadd.s32 4294967294, %s1479_s12   ;;  %s1479_s12 = sphi %s1538_s12, %s1973_s12   ;;  %s1475_s11 = sphi %s1536_s11, %s1972_s11   ;;  %s1471_s10 = sphi %s1534_s10, %s1971_s10   ;;  %s1467_s30 = sphi %s1532_s30, %s1970_s30  }
   0x4   : > { %s1555_s15 = sadd.s32 1, %s1479_s12   ;;  %s223_s16 = sadd.s32 1, %s1475_s11 }
   0x5   : > { %s220_s17 = ssub.s32 %s1479_s12, %s1555_s15  ;;  %p233_p0 = scmp.ne.s32.totalorder %s1475_s11, %s1471_s10 }
   0x6   : > { %p221_p1 = scmp.eq.s32.totalorder %s220_s17, 0  ;;  %p234_p2 = scmp.eq.s32.totalorder %s1192_s13, 1 }
   0x7   : > { %p239_p3 = scmp.ne.s32.totalorder %s1471_s10, %s1467_s30  ;;  %p240_p4 = scmp.eq.s32.totalorder %s1193_s14, 1 }
   0x8   : > { %s1565_s18 = scalar_select %p221_p1, %s1475_s11, %s223_s16  }
   0x9   : > { %p1567_p5 = por %p234_p2, %p233_p0  ;;  %p1571_p6 = por %p240_p4, %p239_p3 }
   0xa   : > { %p1196_p7 = scmp.ge.s32.totalorder %s1479_s12, 1  ;;  %p291_p8 = scmp.lt.s32.totalorder %s1479_s12, 3 }
   0xc   : > { %p292_p9 = pnand %p1196_p7, %p291_p8 }
   0xd   : > { %v348_v0 = vld [vmem:[%s1959_s1] sm:$0xff] (!%p292_p9)  ;;  %v349_v1 = vld [vmem:[%s1959_s1 + $0x8] sm:$0xff] (!%p292_p9)  ;;  %s1583_s25 = sshll.u32 (!%p292_p9), %s1192_s13, 4  ;;  %v592_v5 = vld [vmem:[%s1962_s4 + $0x10] sm:$0xff] (!%p292_p9)  ;;  %vm357_vm0 = vcmask (!%p292_p9), 130048   ;;  %vm605_vm1 = vcmask (!%p292_p9), 523264  }
   0xe   : > { %295 = sbr.rel (%p292_p9) target bundleno = 689 (0x2b1), region = 56  ;;  %v1350_v2 = vpack.c.bf16 (!%p292_p9), %v349_v1, %v348_v0  ;;  %p327_p10 = scmp.lt.s32.totalorder (!%p292_p9), %s1583_s25, 31  ;;  %v590_v3 = vld [vmem:[%s1962_s4] sm:$0xff] (!%p292_p9)  ;;  %v591_v4 = vld [vmem:[%s1962_s4 + $0x8] sm:$0xff] (!%p292_p9)  ;;  %v593_v7 = vld [vmem:[%s1962_s4 + $0x18] sm:$0xff] (!%p292_p9)  ;;  %vm1023_vm2 = vcmask (!%p292_p9), 130112  }
   0xf   : > { %v1354_v6 = vpack.c.bf16 (!%p292_p9), %v591_v4, %v590_v3  ;;  %v1358_v8 = vpack.c.bf16 (!%p292_p9), %v593_v7, %v592_v5  ;;  %v594_v9 = vld [vmem:[%s1962_s4 + $0x20] sm:$0xff] (!%p292_p9)  ;;  %v595_v10 = vld [vmem:[%s1962_s4 + $0x28] sm:$0xff] (!%p292_p9)  ;;  %v596_v28 = vld [vmem:[%s1962_s4 + $0x30] sm:$0xff] (!%p292_p9)  ;;  %vm1030_vm3 = vcmask (!%p292_p9), 195712   ;;  %vm1037_vm4 = vcmask (!%p292_p9), 261312   ;;  %s1914_s28 = scalar_lea.hbm (!%p292_p9), %s1967_s9, %s1583_s25  ;;  %s1481_s16 = smov (!%p292_p9), [#allocation2]  }
  0x10   : > { %1351 = vmatprep.subr.bf16.mxu0 (!%p292_p9), %v1350_v2  ;;  %v1362_v14 = vpack.c.bf16 (!%p292_p9), %v595_v10, %v594_v9  ;;  %v597_v29 = vld [vmem:[%s1962_s4 + $0x38] sm:$0xff] (!%p292_p9)  ;;  %v1699_v31 = vld [vmem:[%s1960_s2] ss:$0 sm:$0xff] (!%p292_p9)  ;;  %vm1044_vm5 = vcmask (!%p292_p9), 326912   ;;  %vm1051_vm6 = vcmask (!%p292_p9), 392512   ;;  %vm1058_vm7 = vcmask (!%p292_p9), 458112  }
  0x11   : > { %1353 = vmatpush3.bf16.msra.mxu0 (!%p292_p9), %v1350_v2  ;;  %1370 = vmatprep.subr.bf16.mxu1 (!%p292_p9), %v1354_v6  ;;  %v1366_v30 = vpack.c.bf16 (!%p292_p9), %v597_v29, %v596_v28  ;;  %v1706_v36 = vld [vmem:[%s1961_s3] ss:$0 sm:$0xff] (!%p292_p9)  ;;  %vm1065_vm8 = vcmask (!%p292_p9), 523712   ;;  %vm1072_vm9 = vcmask (!%p292_p9), 589312   ;;  %vm1079_vm10 = vcmask (!%p292_p9), 654912   ;;  %s1421_s17 = sshll.u32 (!%p292_p9), %s1481_s16, 4  ;;  %s1422_s17 = int_to_ptr.vmem [resolvable:$false] %s1421_s17 }
  0x12   : > { %1355 = vmatprep.subr.bf16.mxu0 (!%p292_p9), %v1354_v6  ;;  %1374 = vmatpush3.bf16.msra.mxu1 (!%p292_p9), %v1354_v6  ;;  %vm1086_vm11 = vcmask (!%p292_p9), 720512   ;;  %vm1093_vm12 = vcmask (!%p292_p9), 786112   ;;  %vm1100_vm13 = vcmask (!%p292_p9), 851712   ;;  %vm1107_vm14 = vcmask (!%p292_p9), 917312   ;;  %s1423_s13 = scalar_lea.vmem (!%p292_p9), %s1422_s17, 32 }
  0x13   : > { %1371 = vmatprep.subr.bf16.mxu1 (!%p292_p9), %v1358_v8  ;;  %vm1114_vm15 = vcmask (!%p292_p9), 982912  }
  0x15   : > { %s328_s21 = scalar_select %p327_p10, %s1583_s25, 31 }
  0x16   : > { %1375 = vmatpush3.bf16.msra.mxu1 %v1358_v8 }
  0x17   : > { %s1198_s22 = sshll.u32 %s328_s21, 3  ;;  %1372 = vmatprep.subr.bf16.mxu1 %v1362_v14 }
  0x18   : > { %s1602_s26 = scalar_lea.vmem %s1958_s0, %s1198_s22  ;;  %s324_s22 = sand.u32 1, %s1471_s10  }
  0x19   : > { %v1611_v11 = vld [vmem:[%s1602_s26] sm:$0xff]  ;;  %v1614_v12 = vld [vmem:[%s1602_s26 + $0x8] sm:$0xff]  ;;  %v1617_v13 = vld [vmem:[%s1602_s26 + $0x10] sm:$0xff]  ;;  %s325_s23 = scalar_lea.vmem [#allocation2], %s324_s22  ;;  %s1126_s29 = scalar_lea.sflag [#allocation3], %s324_s22 }
  0x1a   : > { %1286 = vmatprep.mubr.msk.f32.mxu0 %vm357_vm0, %v1611_v11  ;;  %v1626_v15 = vld [vmem:[%s1602_s26 + $0x18] sm:$0xff]  ;;  %v1629_v16 = vld [vmem:[%s1602_s26 + $0x20] sm:$0xff]  ;;  %1376 = vmatpush3.bf16.msra.mxu1 %v1362_v14  ;;  %v1636_v17 = vld [vmem:[%s1602_s26 + $0x28] sm:$0xff]  ;;  %s1138_s24 = sshll.u32 %s325_s23, 4  ;;  %s1916_s24 = int_to_ptr.vmem [resolvable:$true] %s1138_s24 }
  0x1b   : > { %1287 = vmatmul.mubr.msk.f32.vlgmr.msra.gmra.mrb[0].mxu0 %vm357_vm0, %v1614_v12  ;;  %v1639_v18 = vld [vmem:[%s1602_s26 + $0x30] sm:$0xff]  ;;  %v1646_v19 = vld [vmem:[%s1602_s26 + $0x38] sm:$0xff]  ;;  %v1649_v20 = vld [vmem:[%s1602_s26 + $0x40] sm:$0xff]  ;;  %1373 = vmatprep.subr.bf16.mxu1 %v1366_v30  ;;  %s1417_s14 = scalar_lea.vmem %s1916_s24, 16  ;;  %p1424_p0 = scmp.lt.s32.totalorder %s1916_s24, %s1422_s17 }
  0x1c   : > { %1289 = vmatprep.mubr.msk.f32.mxu0 %vm357_vm0, %v1617_v13  ;;  %1357 = vmatpush3.bf16.msra.mxu0 %v1354_v6  ;;  %v1656_v21 = vld [vmem:[%s1602_s26 + $0x48] sm:$0xff]  ;;  %v1659_v22 = vld [vmem:[%s1602_s26 + $0x50] sm:$0xff]  ;;  %v1666_v23 = vld [vmem:[%s1602_s26 + $0x58] sm:$0xff]  ;;  %p1418_p11 = scmp.ne.s32.totalorder %s1916_s24, %s1417_s14  ;;  %p1425_p1 = scmp.lt.s32.totalorder %s1423_s13, %s1417_s14 }
  0x1d   : > { %1359 = vmatprep.subr.bf16.mxu0 %v1358_v8  ;;  %v1669_v24 = vld [vmem:[%s1602_s26 + $0x60] sm:$0xff]  ;;  %v1676_v25 = vld [vmem:[%s1602_s26 + $0x68] sm:$0xff]  ;;  %v1679_v26 = vld [vmem:[%s1602_s26 + $0x70] sm:$0xff] }
  0x1e   : > { %v1686_v27 = vld [vmem:[%s1602_s26 + $0x78] sm:$0xff]  ;;  %1377 = vmatpush3.bf16.msra.mxu1 %v1366_v30  ;;  %p1419_p12 = pnand %p1418_p11, %p1567_p5  ;;  %p1426_p2 = por %p1425_p1, %p1424_p0 }
  0x1f   : > { %1290 = vmatmul.mubr.msk.f32.gmra.mrb[2].mxu0 %vm357_vm0, %v1626_v15 }
  0x20   : > { %1292 = vmatprep.mubr.msk.f32.mxu0 %vm357_vm0, %v1629_v16  ;;  %1361 = vmatpush3.bf16.msra.mxu0 %v1358_v8  ;;  %p1420_p13 = pneg %p1419_p12 }
  0x21   : > { %1363 = vmatprep.subr.bf16.mxu0 %v1362_v14 }
  0x22   : > { %p1427_p3 = pnand %p1426_p2, %p1420_p13 }
  0x23   : > { %1293 = vmatmul.mubr.msk.f32.gmra.mrb[4].mxu0 %vm357_vm0, %v1636_v17 }
  0x24   : > { %1295 = vmatprep.mubr.msk.f32.mxu0 %vm357_vm0, %v1639_v18  ;;  %1365 = vmatpush3.bf16.msra.mxu0 %v1362_v14 }
  0x25   : > { %1367 = vmatprep.subr.bf16.mxu0 %v1366_v30 }
  0x27   : > { %1296 = vmatmul.mubr.msk.f32.gmra.mrb[6].mxu0 %vm357_vm0, %v1646_v19 }
  0x28   : > { %1298 = vmatprep.mubr.msk.f32.mxu0 %vm357_vm0, %v1649_v20  ;;  %1369 = vmatpush3.bf16.msra.mxu0 %v1366_v30 }
  0x2b   : > { %1299 = vmatmul.mubr.msk.f32.gmra.mrb[8].mxu0 %vm357_vm0, %v1656_v21 }
  0x2c   : > { %1301 = vmatprep.mubr.msk.f32.mxu0 %vm357_vm0, %v1659_v22 }
  0x2f   : > { %1302 = vmatmul.mubr.msk.f32.gmra.mrb[10].mxu0 %vm357_vm0, %v1666_v23 }
  0x30   : > { %1304 = vmatprep.mubr.msk.f32.mxu0 %vm357_vm0, %v1669_v24 }
  0x33   : > { %1305 = vmatmul.mubr.msk.f32.gmra.mrb[12].mxu0 %vm357_vm0, %v1676_v25 }
  0x34   : > { %1307 = vmatprep.mubr.msk.f32.mxu0 %vm357_vm0, %v1679_v26 }
  0x37   : > { %1308 = vmatmul.mubr.msk.f32.gmra.mrb[14].mxu0 %vm357_vm0, %v1686_v27 }
  0xee   : > { %v1288_v32 = vpop.f32.mrb[0].mxu0 }
  0xef   : > { %v478_v33 = vadd.f32 %v1288_v32, %v1699_v31  ;;  %v472_v34 = vpop.f32.mrb[1].mxu0 }
  0xf0   : > { %v473_v35 = vadd.f32 %v1699_v31, %v472_v34 }
  0xf1   : > { %v553_v37 = vmax.f32 %v478_v33, 0.0 }
  0xf2   : > { %v552_v38 = vmax.f32 %v473_v35, 0.0  ;;  %v1291_v39 = vpop.f32.mrb[2].mxu0 }
  0xf3   : > { %v488_v40 = vadd.f32 %v1291_v39, %v1699_v31  ;;  %v482_v41 = vpop.f32.mrb[3].mxu0  ;;  %v575_v44 = vmin.f32 %v1706_v36, %v553_v37 }
  0xf4   : > { %v574_v42 = vmin.f32 %v1706_v36, %v552_v38  ;;  %v483_v43 = vadd.f32 %v1699_v31, %v482_v41 }
  0xf5   : > { %v555_v45 = vmax.f32 %v488_v40, 0.0 }
  0xf6   : > { %v554_v46 = vmax.f32 %v483_v43, 0.0  ;;  %1326 = vmatprep.mubr.msk.f32.mxu0 %vm605_vm1, %v574_v42  ;;  %v1294_v47 = vpop.f32.mrb[4].mxu0 }
  0xf7   : > { %v577_v48 = vmin.f32 %v1706_v36, %v555_v45  ;;  %1327 = vmatmul.mubr.msk.f32.vlgmr.msra.gmra.mrb[16].mxu0 %vm605_vm1, %v575_v44  ;;  %v498_v49 = vadd.f32 %v1294_v47, %v1699_v31  ;;  %v492_v50 = vpop.f32.mrb[5].mxu0 }
  0xf8   : > { %v576_v51 = vmin.f32 %v1706_v36, %v554_v46  ;;  %v493_v52 = vadd.f32 %v1699_v31, %v492_v50 }
  0xf9   : > { %v557_v53 = vmax.f32 %v498_v49, 0.0 }
  0xfa   : > { %1329 = vmatprep.mubr.msk.f32.mxu1 %vm605_vm1, %v576_v51  ;;  %v556_v54 = vmax.f32 %v493_v52, 0.0  ;;  %v1297_v55 = vpop.f32.mrb[6].mxu0  ;;  %v1236_v51 = vld [vmem:[%s1966_s8] ss:$0 sm:$0xff] }
  0xfb   : > { %v579_v56 = vmin.f32 %v1706_v36, %v557_v53  ;;  %1330 = vmatmul.mubr.msk.f32.vlgmr.msra.gmra.mrb[0].mxu1 %vm605_vm1, %v577_v48  ;;  %v508_v57 = vadd.f32 %v1297_v55, %v1699_v31  ;;  %v502_v58 = vpop.f32.mrb[7].mxu0  ;;  %v917_v53 = vmul.f32 %v1236_v51, %v1614_v12  ;;  %v921_v12 = vmul.f32 %v1236_v51, %v1636_v17 }
  0xfc   : > { %v578_v59 = vmin.f32 %v1706_v36, %v556_v54  ;;  %v503_v60 = vadd.f32 %v1699_v31, %v502_v58  ;;  %v925_v17 = vmul.f32 %v1236_v51, %v1656_v21  ;;  %v929_v21 = vmul.f32 %v1236_v51, %v1676_v25 }
  0xfd   : > { %v559_v61 = vmax.f32 %v508_v57, 0.0  ;;  %v935_v54 = vsel %vm357_vm0, %v917_v53, 0.0 }
  0xfe   : > { %1332 = vmatprep.mubr.msk.f32.mxu1 %vm605_vm1, %v578_v59  ;;  %v558_v62 = vmax.f32 %v503_v60, 0.0  ;;  %v1300_v63 = vpop.f32.mrb[8].mxu0  ;;  %v947_v59 = vsel %vm357_vm0, %v921_v12, 0.0 }
  0xff   : > { %v581_v0 = vmin.f32 %v1706_v36, %v559_v61  ;;  %1333 = vmatmul.mubr.msk.f32.gmra.mrb[2].mxu1 %vm605_vm1, %v579_v56  ;;  %v518_v1 = vadd.f32 %v1300_v63, %v1699_v31  ;;  %v512_v2 = vpop.f32.mrb[9].mxu0  ;;  %v919_v56 = vmul.f32 %v1236_v51, %v1626_v15  ;;  %v923_v15 = vmul.f32 %v1236_v51, %v1646_v19 }
 0x100   : > { %v580_v3 = vmin.f32 %v1706_v36, %v558_v62  ;;  %v513_v4 = vadd.f32 %v1699_v31, %v512_v2  ;;  %v959_v63 = vsel %vm357_vm0, %v925_v17, 0.0  ;;  %v927_v19 = vmul.f32 %v1236_v51, %v1666_v23 }
 0x101   : > { %v561_v5 = vmax.f32 %v518_v1, 0.0  ;;  %v941_v57 = vsel %vm357_vm0, %v919_v56, 0.0  ;;  %v953_v61 = vsel %vm357_vm0, %v923_v15, 0.0  ;;  %v931_v23 = vmul.f32 %v1236_v51, %v1686_v27 }
 0x102   : > { %1335 = vmatprep.mubr.msk.f32.mxu1 %vm605_vm1, %v580_v3  ;;  %v560_v6 = vmax.f32 %v513_v4, 0.0  ;;  %v1303_v7 = vpop.f32.mrb[10].mxu0  ;;  %v965_v1 = vsel %vm357_vm0, %v927_v19, 0.0  ;;  %v971_v3 = vsel %vm357_vm0, %v929_v21, 0.0 }
 0x103   : > { %v583_v8 = vmin.f32 %v1706_v36, %v561_v5  ;;  %1336 = vmatmul.mubr.msk.f32.gmra.mrb[4].mxu1 %vm605_vm1, %v581_v0  ;;  %v528_v9 = vadd.f32 %v1303_v7, %v1699_v31  ;;  %v522_v10 = vpop.f32.mrb[11].mxu0  ;;  %v977_v5 = vsel %vm357_vm0, %v931_v23, 0.0 }
 0x104   : > { %v582_v14 = vmin.f32 %v1706_v36, %v560_v6  ;;  %v523_v28 = vadd.f32 %v1699_v31, %v522_v10 }
 0x105   : > { %v563_v29 = vmax.f32 %v528_v9, 0.0 }
 0x106   : > { %1338 = vmatprep.mubr.msk.f32.mxu1 %vm605_vm1, %v582_v14  ;;  %v562_v30 = vmax.f32 %v523_v28, 0.0  ;;  %v1306_v32 = vpop.f32.mrb[12].mxu0  ;;  %v1804_v14 = vld [vmem:[%s1965_s7] ss:$0 sm:$0xff] }
 0x107   : > { %v585_v33 = vmin.f32 %v1706_v36, %v563_v29  ;;  %1339 = vmatmul.mubr.msk.f32.gmra.mrb[6].mxu1 %vm605_vm1, %v583_v8  ;;  %v538_v34 = vadd.f32 %v1306_v32, %v1699_v31  ;;  %v532_v35 = vpop.f32.mrb[13].mxu0 }
 0x108   : > { %v584_v37 = vmin.f32 %v1706_v36, %v562_v30  ;;  %v533_v38 = vadd.f32 %v1699_v31, %v532_v35 }
 0x109   : > { %v565_v39 = vmax.f32 %v538_v34, 0.0 }
 0x10a   : > { %1341 = vmatprep.mubr.msk.f32.mxu1 %vm605_vm1, %v584_v37  ;;  %v564_v40 = vmax.f32 %v533_v38, 0.0  ;;  %v1309_v41 = vpop.f32.mrb[14].mxu0 }
 0x10b   : > { %v587_v42 = vmin.f32 %v1706_v36, %v565_v39  ;;  %1342 = vmatmul.mubr.msk.f32.gmra.mrb[8].mxu1 %vm605_vm1, %v585_v33  ;;  %v548_v43 = vadd.f32 %v1309_v41, %v1699_v31  ;;  %v542_v44 = vpop.f32.mrb[15].mxu0 }
 0x10c   : > { %v586_v45 = vmin.f32 %v1706_v36, %v564_v40  ;;  %v543_v46 = vadd.f32 %v1699_v31, %v542_v44  ;;  %v916_v31 = vmul.f32 %v1236_v51, %v1611_v11  ;;  %v920_v11 = vmul.f32 %v1236_v51, %v1629_v16 }
 0x10d   : > { %v567_v47 = vmax.f32 %v548_v43, 0.0  ;;  %v924_v16 = vmul.f32 %v1236_v51, %v1649_v20  ;;  %v928_v20 = vmul.f32 %v1236_v51, %v1669_v24  ;;  %v1792_v24 = vld [vmem:[%s1963_s5] ss:$0 sm:$0xff] }
 0x10e   : > { %v566_v48 = vmax.f32 %v543_v46, 0.0  ;;  %1344 = vmatprep.mubr.msk.f32.mxu1 %vm605_vm1, %v586_v45  ;;  %v932_v52 = vsel %vm357_vm0, %v916_v31, 0.0  ;;  %v944_v58 = vsel %vm357_vm0, %v920_v11, 0.0 }
 0x10f   : > { %v589_v49 = vmin.f32 %v1706_v36, %v567_v47  ;;  %1345 = vmatmul.mubr.msk.f32.gmra.mrb[10].mxu1 %vm605_vm1, %v587_v42  ;;  %933 = vadd.xlane.f32.xlu1 %v932_v52  ;;  %v956_v62 = vsel %vm357_vm0, %v924_v16, 0.0  ;;  %v968_v2 = vsel %vm357_vm0, %v928_v20, 0.0 }
 0x110   : > { %v588_v50 = vmin.f32 %v1706_v36, %v566_v48  ;;  %v918_v36 = vmul.f32 %v1236_v51, %v1617_v13  ;;  %v922_v13 = vmul.f32 %v1236_v51, %v1639_v18  ;;  %v926_v18 = vmul.f32 %v1236_v51, %v1659_v22 }
 0x111   : > { %v930_v22 = vmul.f32 %v1236_v51, %v1679_v26  ;;  %v1798_v26 = vld [vmem:[%s1964_s6] ss:$0 sm:$0xff] }
 0x112   : > { %1347 = vmatprep.mubr.msk.f32.mxu1 %vm605_vm1, %v588_v50  ;;  %v938_v55 = vsel %vm357_vm0, %v918_v36, 0.0  ;;  %v950_v60 = vsel %vm357_vm0, %v922_v13, 0.0  ;;  %v962_v0 = vsel %vm357_vm0, %v926_v18, 0.0 }
 0x113   : > { %1348 = vmatmul.mubr.msk.f32.gmra.mrb[12].mxu1 %vm605_vm1, %v589_v49  ;;  %936 = vadd.xlane.f32.xlu1 %v935_v54  ;;  %v974_v4 = vsel %vm357_vm0, %v930_v22, 0.0  ;;  %vm1121_vm0 = vcmask 1048512  }
 0x117   : > { %939 = vadd.xlane.f32.xlu1 %v938_v55 }
 0x11b   : > { %942 = vadd.xlane.f32.xlu1 %v941_v57 }
 0x11f   : > { %945 = vadd.xlane.f32.xlu1 %v944_v58 }
 0x123   : > { %948 = vadd.xlane.f32.xlu1 %v947_v59 }
 0x127   : > { %951 = vadd.xlane.f32.xlu1 %v950_v60 }
 0x12b   : > { %954 = vadd.xlane.f32.xlu1 %v953_v61 }
 0x12f   : > { %957 = vadd.xlane.f32.xlu1 %v956_v62 }
 0x133   : > { %960 = vadd.xlane.f32.xlu1 %v959_v63 }
 0x137   : > { %963 = vadd.xlane.f32.xlu1 %v962_v0 }
 0x13b   : > { %966 = vadd.xlane.f32.xlu1 %v965_v1 }
 0x13f   : > { %969 = vadd.xlane.f32.xlu1 %v968_v2 }
 0x143   : > { %972 = vadd.xlane.f32.xlu1 %v971_v3 }
 0x147   : > { %975 = vadd.xlane.f32.xlu1 %v974_v4 }
 0x14b   : > { %978 = vadd.xlane.f32.xlu1 %v977_v5 }
 0x1ca   : > { %v1328_v6 = vpop.f32.mrb[16].mxu0 }
 0x1cb   : > { %v726_v25 = vadd.f32 %v1328_v6, %v1792_v24  ;;  %v720_v7 = vpop.f32.mrb[17].mxu0 }
 0x1cc   : > { %v721_v8 = vadd.f32 %v1792_v24, %v720_v7 }
 0x1cd   : > { %v801_v27 = vmax.f32 %v726_v25, 0.0 }
 0x1ce   : > { %v800_v9 = vmax.f32 %v721_v8, 0.0  ;;  %v1331_v10 = vpop.f32.mrb[0].mxu1 }
 0x1cf   : > { %v823_v28 = vmin.f32 %v1798_v26, %v801_v27  ;;  %v736_v29 = vadd.f32 %v1331_v10, %v1792_v24  ;;  %v730_v30 = vpop.f32.mrb[1].mxu1 }
 0x1d0   : > { %v822_v32 = vmin.f32 %v1798_v26, %v800_v9  ;;  %v731_v33 = vadd.f32 %v1792_v24, %v730_v30 }
 0x1d1   : > { %v803_v34 = vmax.f32 %v736_v29, 0.0  ;;  %v846_v35 = vmul.f32 %v1804_v14, %v823_v28 }
 0x1d2   : > { %v802_v37 = vmax.f32 %v731_v33, 0.0  ;;  %v1334_v38 = vpop.f32.mrb[2].mxu1  ;;  %v845_v43 = vmul.f32 %v1804_v14, %v822_v32 }
 0x1d3   : > { %v825_v39 = vmin.f32 %v1798_v26, %v803_v34  ;;  %v864_v40 = vsel %vm605_vm1, %v846_v35, 0.0  ;;  %v746_v41 = vadd.f32 %v1334_v38, %v1792_v24  ;;  %v740_v42 = vpop.f32.mrb[3].mxu1 }
 0x1d4   : > { %865 = vadd.xlane.f32.xlu0 %v864_v40  ;;  %v741_v44 = vadd.f32 %v1792_v24, %v740_v42  ;;  %v824_v46 = vmin.f32 %v1798_v26, %v802_v37  ;;  %v861_v48 = vsel %vm605_vm1, %v845_v43, 0.0 }
 0x1d5   : > { %v805_v47 = vmax.f32 %v746_v41, 0.0  ;;  %v848_v49 = vmul.f32 %v1804_v14, %v825_v39 }
 0x1d6   : > { %v1337_v45 = vpop.f32.mrb[4].mxu1  ;;  %v804_v51 = vmax.f32 %v741_v44, 0.0  ;;  %v847_v36 = vmul.f32 %v1804_v14, %v824_v46 }
 0x1d7   : > { %v750_v50 = vpop.f32.mrb[5].mxu1  ;;  %v827_v52 = vmin.f32 %v1798_v26, %v805_v47  ;;  %v870_v53 = vsel %vm605_vm1, %v848_v49, 0.0  ;;  %v756_v54 = vadd.f32 %v1337_v45, %v1792_v24 }
 0x1d8   : > { %862 = vadd.xlane.f32.xlu0 %v861_v48  ;;  %v751_v56 = vadd.f32 %v1792_v24, %v750_v50  ;;  %v826_v11 = vmin.f32 %v1798_v26, %v804_v51  ;;  %v867_v12 = vsel %vm605_vm1, %v847_v36, 0.0 }
 0x1d9   : > { %v807_v58 = vmax.f32 %v756_v54, 0.0  ;;  %v850_v59 = vmul.f32 %v1804_v14, %v827_v52 }
 0x1da   : > { %v1340_v31 = vpop.f32.mrb[6].mxu1  ;;  %v806_v60 = vmax.f32 %v751_v56, 0.0  ;;  %v849_v17 = vmul.f32 %v1804_v14, %v826_v11 }
 0x1db   : > { %v760_v55 = vpop.f32.mrb[7].mxu1  ;;  %v829_v61 = vmin.f32 %v1798_v26, %v807_v58  ;;  %v876_v16 = vsel %vm605_vm1, %v850_v59, 0.0  ;;  %v766_v62 = vadd.f32 %v1340_v31, %v1792_v24 }
 0x1dc   : > { %871 = vadd.xlane.f32.xlu0 %v870_v53  ;;  %v761_v18 = vadd.f32 %v1792_v24, %v760_v55  ;;  %v828_v19 = vmin.f32 %v1798_v26, %v806_v60  ;;  %v873_v20 = vsel %vm605_vm1, %v849_v17, 0.0  ;;  %v934_v55 = vpop.xlane.xlu1 %933 }
 0x1dd   : > { %v809_v1 = vmax.f32 %v766_v62, 0.0  ;;  %v852_v2 = vmul.f32 %v1804_v14, %v829_v61 }
 0x1de   : > { %v1343_v57 = vpop.f32.mrb[8].mxu1  ;;  %v808_v3 = vmax.f32 %v761_v18, 0.0  ;;  %v851_v5 = vmul.f32 %v1804_v14, %v828_v19 }
 0x1df   : > { %v770_v13 = vpop.f32.mrb[9].mxu1  ;;  %v831_v22 = vmin.f32 %v1798_v26, %v809_v1  ;;  %v882_v4 = vsel %vm605_vm1, %v852_v2, 0.0  ;;  %v776_v23 = vadd.f32 %v1343_v57, %v1792_v24 }
 0x1e0   : > { %868 = vadd.xlane.f32.xlu0 %v867_v12  ;;  %v771_v6 = vadd.f32 %v1792_v24, %v770_v13  ;;  %v830_v25 = vmin.f32 %v1798_v26, %v808_v3  ;;  %v879_v8 = vsel %vm605_vm1, %v851_v5, 0.0  ;;  %v937_v56 = vpop.xlane.xlu1 %936 }
 0x1e1   : > { %v811_v7 = vmax.f32 %v776_v23, 0.0  ;;  %v854_v27 = vmul.f32 %v1804_v14, %v831_v22 }
 0x1e2   : > { %v1346_v15 = vpop.f32.mrb[10].mxu1  ;;  %v810_v9 = vmax.f32 %v771_v6, 0.0  ;;  %v853_v30 = vmul.f32 %v1804_v14, %v830_v25 }
 0x1e3   : > { %v780_v63 = vpop.f32.mrb[11].mxu1  ;;  %v833_v10 = vmin.f32 %v1798_v26, %v811_v7  ;;  %v888_v28 = vsel %vm605_vm1, %v854_v27, 0.0  ;;  %v786_v29 = vadd.f32 %v1346_v15, %v1792_v24 }
 0x1e4   : > { %877 = vadd.xlane.f32.xlu0 %v876_v16  ;;  %v781_v32 = vadd.f32 %v1792_v24, %v780_v63  ;;  %v832_v33 = vmin.f32 %v1798_v26, %v810_v9  ;;  %v885_v35 = vsel %vm605_vm1, %v853_v30, 0.0  ;;  %v940_v57 = vpop.xlane.xlu1 %939 }
 0x1e5   : > { %v813_v34 = vmax.f32 %v786_v29, 0.0  ;;  %v856_v37 = vmul.f32 %v1804_v14, %v833_v10 }
 0x1e6   : > { %v1349_v0 = vpop.f32.mrb[12].mxu1  ;;  %v812_v38 = vmax.f32 %v781_v32, 0.0  ;;  %v855_v42 = vmul.f32 %v1804_v14, %v832_v33 }
 0x1e7   : > { %v790_v21 = vpop.f32.mrb[13].mxu1  ;;  %v835_v39 = vmin.f32 %v1798_v26, %v813_v34  ;;  %v894_v40 = vsel %vm605_vm1, %v856_v37, 0.0  ;;  %v796_v43 = vadd.f32 %v1349_v0, %v1792_v24 }
 0x1e8   : > { %874 = vadd.xlane.f32.xlu0 %v873_v20  ;;  %v791_v41 = vadd.f32 %v1792_v24, %v790_v21  ;;  %v834_v44 = vmin.f32 %v1798_v26, %v812_v38  ;;  %v891_v46 = vsel %vm605_vm1, %v855_v42, 0.0  ;;  %v943_v11 = vpop.xlane.xlu1 %942 }
 0x1e9   : > { %v858_v47 = vmul.f32 %v1804_v14, %v835_v39  ;;  %v815_v48 = vmax.f32 %v796_v43, 0.0 }
 0x1ea   : > { %v814_v45 = vmax.f32 %v791_v41, 0.0  ;;  %v857_v51 = vmul.f32 %v1804_v14, %v834_v44 }
 0x1eb   : > { %v900_v50 = vsel %vm605_vm1, %v858_v47, 0.0  ;;  %v837_v31 = vmin.f32 %v1798_v26, %v815_v48 }
 0x1ec   : > { %883 = vadd.xlane.f32.xlu0 %v882_v4  ;;  %v836_v49 = vmin.f32 %v1798_v26, %v814_v45  ;;  %v897_v24 = vsel %vm605_vm1, %v857_v51, 0.0  ;;  %v946_v58 = vpop.xlane.xlu1 %945 }
 0x1ed   : > { %v860_v54 = vmul.f32 %v1804_v14, %v837_v31 }
 0x1ee   : > { %v859_v52 = vmul.f32 %v1804_v14, %v836_v49  ;;  %v1012_v14 = vlaneseq }
 0x1ef   : > { %v906_v36 = vsel %vm605_vm1, %v860_v54, 0.0 }
 0x1f0   : > { %880 = vadd.xlane.f32.xlu0 %v879_v8  ;;  %v903_v53 = vsel %vm605_vm1, %v859_v52, 0.0  ;;  %v949_v26 = vpop.xlane.xlu1 %948  ;;  %v1870_v0 = vand.u32 127, %v1012_v14  ;;  %v1873_v20 = vshrl.u32 %v1012_v14, 7 }
 0x1f2   : > { %v1025_v19 = vadd.s32 4294967280, %v1870_v0  ;;  %v1018_v2 = vadd.s32 4294967288, %v1870_v0  ;;  %v1016_v3 = vsub.s32 %v1870_v0, %v1873_v20  ;;  %v1032_v4 = vadd.s32 4294967272, %v1870_v0 }
 0x1f3   : > { %v1039_v6 = vadd.s32 4294967264, %v1870_v0  ;;  %v1053_v9 = vadd.s32 4294967248, %v1870_v0  ;;  %v1046_v37 = vadd.s32 4294967256, %v1870_v0  ;;  %v1060_v39 = vadd.s32 4294967240, %v1870_v0 }
 0x1f4   : > { %889 = vadd.xlane.f32.xlu0 %v888_v28  ;;  %v952_v13 = vpop.xlane.xlu1 %951  ;;  %v1028_v23 = vsub.s32 %v1025_v19, %v1873_v20  ;;  %v1021_v7 = vsub.s32 %v1018_v2, %v1873_v20  ;;  %v1035_v10 = vsub.s32 %v1032_v4, %v1873_v20  ;;  %v1067_v44 = vadd.s32 4294967232, %v1870_v0 }
 0x1f5   : > { %v1042_v29 = vsub.s32 %v1039_v6, %v1873_v20  ;;  %v1049_v47 = vsub.s32 %v1046_v37, %v1873_v20  ;;  %v1063_v51 = vsub.s32 %v1060_v39, %v1873_v20  ;;  %v1081_v31 = vadd.s32 4294967216, %v1870_v0 }
 0x1f6   : > { %v1102_v19 = vadd.s32 4294967192, %v1870_v0  ;;  %v1109_v4 = vadd.s32 4294967184, %v1870_v0 }
 0x1f8   : > { %886 = vadd.xlane.f32.xlu0 %v885_v35  ;;  %v955_v61 = vpop.xlane.xlu1 %954 }
 0x1fc   : > { %895 = vadd.xlane.f32.xlu0 %v894_v40  ;;  %v958_v62 = vpop.xlane.xlu1 %957  ;;  %v1056_v40 = vsub.s32 %v1053_v9, %v1873_v20  ;;  %v1112_v9 = vsub.s32 %v1109_v4, %v1873_v20 }
 0x200   : > { %892 = vadd.xlane.f32.xlu0 %v891_v46  ;;  %v1868_v18 = vpop.xlane.xlu1 %960 }
 0x204   : > { %901 = vadd.xlane.f32.xlu0 %v900_v50  ;;  %v964_v21 = vpop.xlane.xlu1 %963 }
 0x208   : > { %898 = vadd.xlane.f32.xlu0 %v897_v24  ;;  %v967_v33 = vpop.xlane.xlu1 %966 }
 0x20c   : > { %904 = vadd.xlane.f32.xlu0 %v903_v53  ;;  %v970_v49 = vpop.xlane.xlu1 %969  ;;  %v1070_v53 = vsub.s32 %v1067_v44, %v1873_v20 }
 0x210   : > { %907 = vadd.xlane.f32.xlu0 %v906_v36 }
 0x261   : > { %v866_v12 = vpop.xlane.xlu0 %865 }
 0x262   : > { %v981_v8 = vadd.f32 %v937_v56, %v866_v12  ;;  %v1084_v12 = vsub.s32 %v1081_v31, %v1873_v20 }
 0x264   : > { %v1022_v34 = vrot.slane %v981_v8, %v1021_v7  ;;  %v1116_v7 = vadd.s32 4294967176, %v1870_v0 }
 0x265   : > { %v863_v59 = vpop.xlane.xlu0 %862 }
 0x266   : > { %v980_v22 = vadd.f32 %v934_v55, %v863_v59 }
 0x268   : > { %v1017_v27 = vrot.slane %v980_v22, %v1016_v3 }
 0x269   : > { %v872_v60 = vpop.xlane.xlu0 %871 }
 0x26a   : > { %v983_v35 = vadd.f32 %v943_v11, %v872_v60  ;;  %v1024_v38 = vsel %vm1023_vm2, %v1022_v34, %v1017_v27  ;;  %v973_v60 = vpop.xlane.xlu1 %972  ;;  %v1119_v34 = vsub.s32 %v1116_v7, %v1873_v20 }
 0x26c   : > { %v1036_v46 = vrot.slane %v983_v35, %v1035_v10 }
 0x26d   : > { %v869_v15 = vpop.xlane.xlu0 %868 }
 0x26e   : > { %v982_v5 = vadd.f32 %v940_v57, %v869_v15  ;;  %v1074_v57 = vadd.s32 4294967224, %v1870_v0  ;;  %v976_v22 = vpop.xlane.xlu1 %975 }
 0x270   : > { %v1029_v28 = vrot.slane %v982_v5, %v1028_v23 }
 0x271   : > { %v878_v16 = vpop.xlane.xlu0 %877 }
 0x272   : > { %v1031_v41 = vsel %vm1030_vm3, %v1029_v28, %v1024_v38  ;;  %v985_v48 = vadd.f32 %v949_v26, %v878_v16  ;;  %v1095_v16 = vadd.s32 4294967200, %v1870_v0 }
 0x273   : > { %v1038_v50 = vsel %vm1037_vm4, %v1036_v46, %v1031_v41 }
 0x274   : > { %v1050_v55 = vrot.slane %v985_v48, %v1049_v47 }
 0x275   : > { %v875_v17 = vpop.xlane.xlu0 %874 }
 0x276   : > { %v984_v30 = vadd.f32 %v946_v58, %v875_v17  ;;  %v1088_v58 = vadd.s32 4294967208, %v1870_v0  ;;  %v1077_v17 = vsub.s32 %v1074_v57, %v1873_v20 }
 0x278   : > { %v1043_v42 = vrot.slane %v984_v30, %v1042_v29 }
 0x279   : > { %v884_v63 = vpop.xlane.xlu0 %883 }
 0x27a   : > { %v1045_v24 = vsel %vm1044_vm5, %v1043_v42, %v1038_v50  ;;  %v987_v56 = vadd.f32 %v955_v61, %v884_v63  ;;  %v1091_v63 = vsub.s32 %v1088_v58, %v1873_v20 }
 0x27b   : > { %v1052_v11 = vsel %vm1051_vm6, %v1050_v55, %v1045_v24 }
 0x27d   : > { %v881_v1 = vpop.xlane.xlu0 %880 }
 0x27e   : > { %v986_v43 = vadd.f32 %v952_v13, %v881_v1 }
 0x280   : > { %v1057_v52 = vrot.slane %v986_v43, %v1056_v40 }
 0x281   : > { %v890_v25 = vpop.xlane.xlu0 %889 }
 0x282   : > { %v1059_v26 = vsel %vm1058_vm7, %v1057_v52, %v1052_v11  ;;  %v989_v61 = vadd.f32 %v1868_v18, %v890_v25  ;;  %v1105_v25 = vsub.s32 %v1102_v19, %v1873_v20 }
 0x284   : > { %v1078_v23 = vrot.slane %v989_v61, %v1077_v17 }
 0x285   : > { %v887_v32 = vpop.xlane.xlu0 %886 }
 0x286   : > { %v988_v54 = vadd.f32 %v958_v62, %v887_v32  ;;  %v1064_v62 = vrot.slane %v987_v56, %v1063_v51  ;;  %v979_v32 = vpop.xlane.xlu1 %978 }
 0x288   : > { %v1071_v59 = vrot.slane %v988_v54, %v1070_v53  ;;  %v1066_v14 = vsel %vm1065_vm8, %v1064_v62, %v1059_v26 }
 0x289   : > { %v896_v45 = vpop.xlane.xlu0 %895 }
 0x28a   : > { %v1073_v1 = vsel %vm1072_vm9, %v1071_v59, %v1066_v14  ;;  %v991_v5 = vadd.f32 %v967_v33, %v896_v45 }
 0x28b   : > { %v1080_v6 = vsel %vm1079_vm10, %v1078_v23, %v1073_v1 }
 0x28c   : > { %v1092_v28 = vrot.slane %v991_v5, %v1091_v63 }
 0x28d   : > { %v893_v36 = vpop.xlane.xlu0 %892 }
 0x28e   : > { %v990_v13 = vadd.f32 %v964_v21, %v893_v36  ;;  %v1098_v21 = vsub.s32 %v1095_v16, %v1873_v20 }
 0x290   : > { %v1085_v2 = vrot.slane %v990_v13, %v1084_v12 }
 0x291   : > { %v902_v15 = vpop.xlane.xlu0 %901 }
 0x292   : > { %v1087_v8 = vsel %vm1086_vm11, %v1085_v2, %v1080_v6  ;;  %v993_v29 = vadd.f32 %v973_v60, %v902_v15 }
 0x293   : > { %v1094_v33 = vsel %vm1093_vm12, %v1092_v28, %v1087_v8 }
 0x294   : > { %v1106_v38 = vrot.slane %v993_v29, %v1105_v25 }
 0x295   : > { %v899_v3 = vpop.xlane.xlu0 %898 }
 0x296   : > { %v992_v18 = vadd.f32 %v970_v49, %v899_v3 }
 0x298   : > { %v1099_v27 = vrot.slane %v992_v18, %v1098_v21 }
 0x299   : > { %v905_v10 = vpop.xlane.xlu0 %904 }
 0x29a   : > { %v994_v30 = vadd.f32 %v976_v22, %v905_v10  ;;  %v1101_v35 = vsel %vm1100_vm13, %v1099_v27, %v1094_v33 }
 0x29b   : > { %v1108_v41 = vsel %vm1107_vm14, %v1106_v38, %v1101_v35 }
 0x29c   : > { %v1113_v37 = vrot.slane %v994_v30, %v1112_v9 }
 0x29d   : > { %v908_v0 = vpop.xlane.xlu0 %907 }
 0x29e   : > { %v995_v39 = vadd.f32 %v979_v32, %v908_v0  ;;  %v1115_v42 = vsel %vm1114_vm15, %v1113_v37, %v1108_v41 }
 0x2a0   : > { %v1120_v40 = vrot.slane %v995_v39, %v1119_v34 }
 0x2a2   : > { %v1122_v20 = vsel %vm1121_vm0, %v1120_v40, %v1115_v42 }
 0x2a3   : > { %1124 = vst [vmem:[%s325_s23] sm:$0x1] %v1122_v20 }
 0x2a4   : > { %1430 = shalt.err (!%p1427_p3)
}
 0x2a5   : > { %s1431_s25 = scalar_lea.hbm %s1914_s28, 16  ;;  %s1435_s23 = scalar_lea.hbm %s1967_s9, 32 }
 0x2a6   : > { %p1432_p4 = scmp.ne.s32.totalorder %s1914_s28, %s1431_s25  ;;  %p1436_p9 = scmp.lt.u32.totalorder %s1914_s28, %s1967_s9 }
 0x2a7   : > { %p1437_p10 = scmp.lt.u32.totalorder %s1435_s23, %s1431_s25  ;;  %p1439_p12 = scmp.lt.u32.totalorder %s1431_s25, %s1914_s28 }
 0x2a8   : > { %p1433_p7 = pnand %p1432_p4, %p1567_p5 }
 0x2a9   : > { %p1438_p11 = por %p1437_p10, %p1436_p9 }
 0x2aa   : > { %p1434_p8 = pneg %p1433_p7 }
 0x2ab   : > { %p1440_p13 = por %p1439_p12, %p1438_p11 }
 0x2ad   : > { %p1441_p0 = pnand %p1440_p13, %p1434_p8 }
 0x2af   : > { %1444 = shalt.err (!%p1441_p0)
}
 0x2b0   : > { %1378 = dma.vmem_to_hbm [thread:$0]  (%p1567_p5), %s1916_s24, 16, %s1914_s28, %s1126_s29  }
 0x2b1 PF: > { %p1384_p1 = scmp.ge.s32.totalorder %s1479_s12, 2  ;;  %s1150_s14 = sand.u32 1, %s1467_s30  }
 0x2b2   : > { %s1151_s16 = scalar_lea.sflag [#allocation3], %s1150_s14 }
 0x2b3   : > { %p1381_p2 = pnand %p1384_p1, %p1571_p6 }
 0x2b5   : > { %1462 = dma.done.wait (!%p1381_p2), %s1151_s16, 16  }
 0x2b6   : > { %1464 = vsyncadd (!%p1381_p2), %s1151_s16, 4294967280  ;;  %p19_p3 = scmp.ge.s32.totalorder %s1555_s15, 4   ;;  %s1970_s30 = smov %s1471_s10 }
 0x2b7   : > { %s1971_s10 = smov %s1475_s11  ;;  %s1972_s11 = smov %s1565_s18 }
 0x2b8   : > { %s1973_s12 = smov %s1555_s15  ;;  %21 = sbr.rel (!%p19_p3) target bundleno = 3 (0x3), region = 91 }
 0x2bf   :  { %1155 = vsyncpa [#allocation3], 1 }
 0x2c0   :  { %1157 = vsyncpa [#allocation3 + $0x1], 1 }

</bundles_post_ra>
